<compile_context>
chip_gen: v6e
topology: v6e:2x2x1
jax: 0.10.0
libtpu: 0.0.40
codegen_flags: <defaults>
</compile_context>

<pallas_src>
import functools

import jax
import jax.numpy as jnp
from jax.experimental import pallas as pl
from jax.experimental.pallas import tpu as pltpu


# ---------------------------------------------------------------------------
# In-kernel math helpers (all f32)
# ---------------------------------------------------------------------------
_SQRT_2_OVER_PI = 0.7978845608028654


def _gelu(x):
    # tanh-approximate GELU: lowers tanh to the EUP (free VLIW slot).
    # NOTE: differs from torch.nn.GELU()'s exact erf at ~1e-3 relative level.
    return 0.5 * x * (1.0 + jnp.tanh(_SQRT_2_OVER_PI * (x + 0.044715 * x * x * x)))


def _layernorm(x, gamma, beta, eps=1e-5):
    # Fused single-pass mean/variance (sum + sum-of-squares).
    h = x.shape[-1]
    inv_h = 1.0 / h
    s = jnp.sum(x, axis=-1, keepdims=True)
    ss = jnp.sum(x * x, axis=-1, keepdims=True)
    mu = s * inv_h
    var = ss * inv_h - mu * mu
    return (x - mu) * jax.lax.rsqrt(var + eps) * gamma + beta


# ---------------------------------------------------------------------------
# Kernel: one (batch_tile, layer) grid step of the fused forward pass
# ---------------------------------------------------------------------------
def model_kernel(x_ref, w_in_ref, b_in_ref,
                 rw1_ref, rb1_ref, rw2_ref, rb2_ref, g_ref, be_ref,
                 w_out_ref, b_out_ref, o_ref, h_ref, *, apply_softmax):
    l = pl.program_id(1)
    n_layers = pl.num_programs(1)

    # --- Input layer (only at l == 0): Linear -> GELU (Dropout == identity) ---
    @pl.when(l == 0)
    def _():
        x = x_ref[...].astype(jnp.bfloat16)                           # [Bt, D]
        h0 = (jnp.dot(x, w_in_ref[...], preferred_element_type=jnp.float32)
              + b_in_ref[...])                                        # [Bt, H] f32
        h_ref[...] = _gelu(h0)

    # --- Residual MLP block l (weights double-buffered per layer) ---
    h = h_ref[...]                                                    # [Bt, H] f32
    y = (jnp.dot(h.astype(jnp.bfloat16), rw1_ref[0],
                 preferred_element_type=jnp.float32) + rb1_ref[0])
    y = _gelu(y)
    y = (jnp.dot(y.astype(jnp.bfloat16), rw2_ref[0],
                 preferred_element_type=jnp.float32) + rb2_ref[0])
    y = _layernorm(y, g_ref[0], be_ref[0])
    h = h + y
    h_ref[...] = h

    # --- Output head + softmax (only at the last layer) ---
    @pl.when(l == n_layers - 1)
    def _():
        logits = (jnp.dot(h.astype(jnp.bfloat16), w_out_ref[...],
                          preferred_element_type=jnp.float32)
                  + b_out_ref[...])                                   # [Bt, A_pad]
        if apply_softmax:  # algorithm == 'policy_gradient'
            m = jnp.max(logits, axis=-1, keepdims=True)
            e = jnp.exp(logits - m)
            logits = e * pl.reciprocal(jnp.sum(e, axis=-1, keepdims=True),
                                       approx=True)
        o_ref[...] = logits.astype(o_ref.dtype)


# ---------------------------------------------------------------------------
# Wrapper
# ---------------------------------------------------------------------------
def _round_up(x, m):
    return ((x + m - 1) // m) * m


def model_forward(state, params, *, num_layers, apply_softmax=True):
    """state: [B, F, F] float32 -> [B, F*F] probabilities (or logits)."""
    assert num_layers >= 1
    B = state.shape[0]
    x = state.reshape(B, -1).astype(jnp.float32)     # nn.Flatten(start_dim=1)
    D = x.shape[1]
    H = params["w_in"].shape[1]
    A = params["w_out"].shape[1]

    # ---- batch tiling (lane/sublane friendly, parallel across cores) ----
    B_tile = min(256, _round_up(B, 8))
    B_pad = _round_up(B, B_tile)
    nb = B_pad // B_tile
    if B_pad != B:
        x = jnp.pad(x, ((0, B_pad - B), (0, 0)))

    # ---- lane-dense output head: pad A to a multiple of 128 lanes ----
    A_pad = _round_up(A, 128)
    w_out = params["w_out"]
    b_out = params["b_out"]
    if A_pad != A:
        w_out = jnp.pad(w_out, ((0, 0), (0, A_pad - A)))
        # -1e30 bias on padded columns -> exp underflows to 0 under softmax
        b_out = jnp.concatenate(
            [b_out, jnp.full((1, A_pad - A), -1e30, jnp.float32)], axis=1)

    # ---- bf16 weights for the MXU; biases / LN params stay f32 ----
    w_in = params["w_in"].astype(jnp.bfloat16)
    rw1 = params["rw1"].astype(jnp.bfloat16)
    rw2 = params["rw2"].astype(jnp.bfloat16)
    w_out = w_out.astype(jnp.bfloat16)

    args = (x, w_in, params["b_in"],
            rw1, params["rb1"], rw2, params["rb2"],
            params["ln_g"], params["ln_b"],
            w_out, b_out)

    in_specs = [
        pl.BlockSpec((B_tile, D), lambda b, l: (b, 0)),      # x (resident over l)
        pl.BlockSpec((D, H),      lambda b, l: (0, 0)),      # w_in (resident)
        pl.BlockSpec((1, H),      lambda b, l: (0, 0)),      # b_in
        pl.BlockSpec((1, H, H),   lambda b, l: (l, 0, 0)),   # rw1 (per-layer)
        pl.BlockSpec((1, 1, H),   lambda b, l: (l, 0, 0)),   # rb1
        pl.BlockSpec((1, H, H),   lambda b, l: (l, 0, 0)),   # rw2
        pl.BlockSpec((1, 1, H),   lambda b, l: (l, 0, 0)),   # rb2
        pl.BlockSpec((1, 1, H),   lambda b, l: (l, 0, 0)),   # ln gamma
        pl.BlockSpec((1, 1, H),   lambda b, l: (l, 0, 0)),   # ln beta
        pl.BlockSpec((H, A_pad),  lambda b, l: (0, 0)),      # w_out (resident)
        pl.BlockSpec((1, A_pad),  lambda b, l: (0, 0)),      # b_out
    ]
    out_specs = pl.BlockSpec((B_tile, A_pad), lambda b, l: (b, 0))

    # VMEM budget estimate (double-buffered blocks) -> explicit scoped limit,
    # kept under v7x's 64 MiB physical VMEM.
    est = (2 * B_tile * D * 4                      # x
           + 2 * B_tile * A_pad * 4                # out
           + 2 * (D * H + H * A_pad) * 2           # w_in + w_out (bf16)
           + 2 * 2 * H * H * 2                     # rw1 + rw2 (bf16, dbl-buffered)
           + 2 * 6 * H * 4                         # biases + LN params
           + B_tile * H * 4)                       # h scratch
    vmem_limit = int(min(max(2 * est, 32 * 1024 * 1024), 48 * 1024 * 1024))

    kernel = functools.partial(model_kernel, apply_softmax=apply_softmax)

    out = pl.pallas_call(
        kernel,
        out_shape=jax.ShapeDtypeStruct((B_pad, A_pad), jnp.float32),
        grid=(nb, num_layers),
        in_specs=in_specs,
        out_specs=out_specs,
        scratch_shapes=[pltpu.VMEM((B_tile, H), jnp.float32)],
        compiler_params=pltpu.CompilerParams(
            dimension_semantics=("parallel", "arbitrary"),
            vmem_limit_bytes=vmem_limit),
    )(*args)

    return out[:B, :A]


# ---------------------------------------------------------------------------
# Deterministic parameter construction (mimics nn.Linear / nn.LayerNorm init)
# ---------------------------------------------------------------------------
def init_params(key, dims_state, hidden, num_actions, num_layers):
    def linear(k, fan_in, fan_out):
        kw, kb = jax.random.split(k)
        bound = 1.0 / jnp.sqrt(fan_in)
        w = jax.random.uniform(kw, (fan_in, fan_out), jnp.float32, -bound, bound)
        b = jax.random.uniform(kb, (1, fan_out), jnp.float32, -bound, bound)
        return w, b

    keys = jax.random.split(key, 2 + 2 * num_layers)
    w_in, b_in = linear(keys[0], dims_state, hidden)
    w_out, b_out = linear(keys[1], hidden, num_actions)

    rw1, rb1, rw2, rb2 = [], [], [], []
    for l in range(num_layers):
        w1, b1 = linear(keys[2 + 2 * l], hidden, hidden)
        w2, b2 = linear(keys[3 + 2 * l], hidden, hidden)
        rw1.append(w1); rb1.append(b1); rw2.append(w2); rb2.append(b2)

    return dict(
        w_in=w_in, b_in=b_in,
        rw1=jnp.stack(rw1), rb1=jnp.stack(rb1),                # [L, H, H], [L, 1, H]
        rw2=jnp.stack(rw2), rb2=jnp.stack(rb2),
        ln_g=jnp.ones((num_layers, 1, hidden), jnp.float32),   # LayerNorm weight
        ln_b=jnp.zeros((num_layers, 1, hidden), jnp.float32),  # LayerNorm bias
        w_out=w_out, b_out=b_out,
    )


# ---------------------------------------------------------------------------
# Pure-JAX reference (same math, f32 weights) for a sanity check
# ---------------------------------------------------------------------------
def reference_forward(state, params, *, num_layers, apply_softmax=True):
    x = state.reshape(state.shape[0], -1).astype(jnp.float32)
    h = _gelu(x @ params["w_in"] + params["b_in"])
    for l in range(num_layers):
        y = _gelu(h @ params["rw1"][l] + params["rb1"][l])
        y = y @ params["rw2"][l] + params["rb2"][l]
        y = _layernorm(y, params["ln_g"][l], params["ln_b"][l])
        h = h + y
    logits = h @ params["w_out"] + params["b_out"]
    if apply_softmax:
        logits = jax.nn.softmax(logits, axis=-1)
    return logits


if __name__ == "__main__":
    # Small, module-consistent config: field_size=4 -> D = A = 16, hidden=128, 2 blocks.
    field_size = 4
    dims_state = field_size ** 2
    num_actions = field_size ** 2
    hidden = 128
    num_layers = 2
    batch = 2

    key = jax.random.PRNGKey(0)
    k_param, k_x = jax.random.split(key)
    params = init_params(k_param, dims_state, hidden, num_actions, num_layers)
    state = jax.random.normal(k_x, (batch, field_size, field_size), jnp.float32)

    out = model_forward(state, params, num_layers=num_layers, apply_softmax=True)
    out = jax.block_until_ready(out)

    assert out.shape == (batch, num_actions)
    # softmax rows sum to 1 (approx reciprocal -> loose tolerance)
    assert bool(jnp.allclose(jnp.sum(out, axis=-1), 1.0, atol=5e-3))
    # matches the pure-JAX reference up to bf16 matmul / approx-reciprocal error
    ref = reference_forward(state, params, num_layers=num_layers, apply_softmax=True)
    assert bool(jnp.allclose(out, ref, atol=5e-2))
    print("KERNEL_OK")
</pallas_src>

<mosaic_0001>
module attributes {stable_mosaic.version = 11 : i64} {
  func.func @model_kernel(%arg0: i32, %arg1: i32, %arg2: memref<8x16xf32, #tpu.memory_space<vmem>>, %arg3: memref<16x128xbf16, #tpu.memory_space<vmem>>, %arg4: memref<1x128xf32, #tpu.memory_space<vmem>>, %arg5: memref<1x128x128xbf16, #tpu.memory_space<vmem>>, %arg6: memref<1x1x128xf32, #tpu.memory_space<vmem>>, %arg7: memref<1x128x128xbf16, #tpu.memory_space<vmem>>, %arg8: memref<1x1x128xf32, #tpu.memory_space<vmem>>, %arg9: memref<1x1x128xf32, #tpu.memory_space<vmem>>, %arg10: memref<1x1x128xf32, #tpu.memory_space<vmem>>, %arg11: memref<128x128xbf16, #tpu.memory_space<vmem>>, %arg12: memref<1x128xf32, #tpu.memory_space<vmem>>, %arg13: memref<8x128xf32, #tpu.memory_space<vmem>>, %arg14: memref<8x128xf32, #tpu.memory_space<vmem>>) attributes {dimension_semantics = [#tpu.dimension_semantics<parallel>, #tpu.dimension_semantics<arbitrary>], iteration_bounds = array<i64: 1, 2>, scalar_prefetch = 0 : i64, scratch_operands = 1 : i64, tpu.core_type = #tpu.core_type<tc>, window_params = [{transform_indices = @transform_0, window_bounds = array<i64: 8, 16>}, {pipeline_mode = #tpu.pipeline_mode<synchronous>, transform_indices = @transform_1, window_bounds = array<i64: 16, 128>}, {pipeline_mode = #tpu.pipeline_mode<synchronous>, transform_indices = @transform_2, window_bounds = array<i64: 1, 128>}, {transform_indices = @transform_3, window_bounds = array<i64: 1, 128, 128>}, {transform_indices = @transform_4, window_bounds = array<i64: 1, 1, 128>}, {transform_indices = @transform_5, window_bounds = array<i64: 1, 128, 128>}, {transform_indices = @transform_6, window_bounds = array<i64: 1, 1, 128>}, {transform_indices = @transform_7, window_bounds = array<i64: 1, 1, 128>}, {transform_indices = @transform_8, window_bounds = array<i64: 1, 1, 128>}, {pipeline_mode = #tpu.pipeline_mode<synchronous>, transform_indices = @transform_9, window_bounds = array<i64: 128, 128>}, {pipeline_mode = #tpu.pipeline_mode<synchronous>, transform_indices = @transform_10, window_bounds = array<i64: 1, 128>}, {transform_indices = @transform_11, window_bounds = array<i64: 8, 128>}]} {
    %c0_i32 = arith.constant 0 : i32
    %0 = arith.cmpi eq, %arg1, %c0_i32 : i32
    %1 = arith.extui %0 : i1 to i32
    %c0_i32_0 = arith.constant 0 : i32
    %2 = arith.cmpi ne, %1, %c0_i32_0 : i32
    scf.if %2 {
      %c0_33 = arith.constant 0 : index
      %c0_34 = arith.constant 0 : index
      %64 = vector.load %arg2[%c0_33, %c0_34] : memref<8x16xf32, #tpu.memory_space<vmem>>, vector<8x16xf32>
      %65 = arith.truncf %64 : vector<8x16xf32> to vector<8x16xbf16>
      %c0_35 = arith.constant 0 : index
      %c0_36 = arith.constant 0 : index
      %66 = vector.load %arg3[%c0_35, %c0_36] : memref<16x128xbf16, #tpu.memory_space<vmem>>, vector<16x128xbf16>
      %cst_37 = arith.constant dense<0.000000e+00> : vector<8x128xf32>
      %67 = tpu.matmul %65, %66, %cst_37 {dimension_numbers = #tpu.dot_dimension_numbers<[1], [0], [0], [1], [0, 0, 1, 1], [], []>} : vector<8x16xbf16>, vector<16x128xbf16>, vector<8x128xf32> -> vector<8x128xf32>
      %c0_38 = arith.constant 0 : index
      %c0_39 = arith.constant 0 : index
      %68 = vector.load %arg4[%c0_38, %c0_39] : memref<1x128xf32, #tpu.memory_space<vmem>>, vector<1x128xf32>
      %69 = vector.broadcast %68 : vector<1x128xf32> to vector<8x128xf32>
      %70 = arith.addf %67, %69 : vector<8x128xf32>
      %cst_40 = arith.constant 5.000000e-01 : f32
      %71 = vector.broadcast %cst_40 : f32 to vector<8x128xf32>
      %72 = arith.mulf %71, %70 : vector<8x128xf32>
      %cst_41 = arith.constant 4.471500e-02 : f32
      %73 = vector.broadcast %cst_41 : f32 to vector<8x128xf32>
      %74 = arith.mulf %73, %70 : vector<8x128xf32>
      %75 = arith.mulf %74, %70 : vector<8x128xf32>
      %76 = arith.mulf %75, %70 : vector<8x128xf32>
      %77 = arith.addf %70, %76 : vector<8x128xf32>
      %cst_42 = arith.constant 0.797884583 : f32
      %78 = vector.broadcast %cst_42 : f32 to vector<8x128xf32>
      %79 = arith.mulf %78, %77 : vector<8x128xf32>
      %80 = math.tanh %79 : vector<8x128xf32>
      %cst_43 = arith.constant 1.000000e+00 : f32
      %81 = vector.broadcast %cst_43 : f32 to vector<8x128xf32>
      %82 = arith.addf %81, %80 : vector<8x128xf32>
      %83 = arith.mulf %72, %82 : vector<8x128xf32>
      %c0_44 = arith.constant 0 : index
      %c0_45 = arith.constant 0 : index
      %84 = vector.load %arg14[%c0_44, %c0_45] : memref<8x128xf32, #tpu.memory_space<vmem>>, vector<8x128xf32>
      tpu.vector_store %arg14[%c0_44, %c0_45], %83 {strides = array<i32>} : memref<8x128xf32, #tpu.memory_space<vmem>>, vector<8x128xf32>,
    } else {
    }
    %c0 = arith.constant 0 : index
    %c0_1 = arith.constant 0 : index
    %3 = vector.load %arg14[%c0, %c0_1] : memref<8x128xf32, #tpu.memory_space<vmem>>, vector<8x128xf32>
    %4 = arith.truncf %3 : vector<8x128xf32> to vector<8x128xbf16>
    %c0_2 = arith.constant 0 : index
    %c0_3 = arith.constant 0 : index
    %c0_4 = arith.constant 0 : index
    %5 = vector.load %arg5[%c0_2, %c0_3, %c0_4] : memref<1x128x128xbf16, #tpu.memory_space<vmem>>, vector<1x128x128xbf16>
    %6 = vector.shape_cast %5 : vector<1x128x128xbf16> to vector<128x128xbf16>
    %cst = arith.constant dense<0.000000e+00> : vector<8x128xf32>
    %7 = tpu.matmul %4, %6, %cst {dimension_numbers = #tpu.dot_dimension_numbers<[1], [0], [0], [1], [0, 0, 1, 1], [], []>} : vector<8x128xbf16>, vector<128x128xbf16>, vector<8x128xf32> -> vector<8x128xf32>
    %c0_5 = arith.constant 0 : index
    %c0_6 = arith.constant 0 : index
    %c0_7 = arith.constant 0 : index
    %8 = vector.load %arg6[%c0_5, %c0_6, %c0_7] : memref<1x1x128xf32, #tpu.memory_space<vmem>>, vector<1x1x128xf32>
    %9 = vector.shape_cast %8 : vector<1x1x128xf32> to vector<1x128xf32>
    %10 = vector.broadcast %9 : vector<1x128xf32> to vector<8x128xf32>
    %11 = arith.addf %7, %10 : vector<8x128xf32>
    %cst_8 = arith.constant 5.000000e-01 : f32
    %12 = vector.broadcast %cst_8 : f32 to vector<8x128xf32>
    %13 = arith.mulf %12, %11 : vector<8x128xf32>
    %cst_9 = arith.constant 4.471500e-02 : f32
    %14 = vector.broadcast %cst_9 : f32 to vector<8x128xf32>
    %15 = arith.mulf %14, %11 : vector<8x128xf32>
    %16 = arith.mulf %15, %11 : vector<8x128xf32>
    %17 = arith.mulf %16, %11 : vector<8x128xf32>
    %18 = arith.addf %11, %17 : vector<8x128xf32>
    %cst_10 = arith.constant 0.797884583 : f32
    %19 = vector.broadcast %cst_10 : f32 to vector<8x128xf32>
    %20 = arith.mulf %19, %18 : vector<8x128xf32>
    %21 = math.tanh %20 : vector<8x128xf32>
    %cst_11 = arith.constant 1.000000e+00 : f32
    %22 = vector.broadcast %cst_11 : f32 to vector<8x128xf32>
    %23 = arith.addf %22, %21 : vector<8x128xf32>
    %24 = arith.mulf %13, %23 : vector<8x128xf32>
    %25 = arith.truncf %24 : vector<8x128xf32> to vector<8x128xbf16>
    %c0_12 = arith.constant 0 : index
    %c0_13 = arith.constant 0 : index
    %c0_14 = arith.constant 0 : index
    %26 = vector.load %arg7[%c0_12, %c0_13, %c0_14] : memref<1x128x128xbf16, #tpu.memory_space<vmem>>, vector<1x128x128xbf16>
    %27 = vector.shape_cast %26 : vector<1x128x128xbf16> to vector<128x128xbf16>
    %cst_15 = arith.constant dense<0.000000e+00> : vector<8x128xf32>
    %28 = tpu.matmul %25, %27, %cst_15 {dimension_numbers = #tpu.dot_dimension_numbers<[1], [0], [0], [1], [0, 0, 1, 1], [], []>} : vector<8x128xbf16>, vector<128x128xbf16>, vector<8x128xf32> -> vector<8x128xf32>
    %c0_16 = arith.constant 0 : index
    %c0_17 = arith.constant 0 : index
    %c0_18 = arith.constant 0 : index
    %29 = vector.load %arg8[%c0_16, %c0_17, %c0_18] : memref<1x1x128xf32, #tpu.memory_space<vmem>>, vector<1x1x128xf32>
    %30 = vector.shape_cast %29 : vector<1x1x128xf32> to vector<1x128xf32>
    %31 = vector.broadcast %30 : vector<1x128xf32> to vector<8x128xf32>
    %32 = arith.addf %28, %31 : vector<8x128xf32>
    %c0_19 = arith.constant 0 : index
    %c0_20 = arith.constant 0 : index
    %c0_21 = arith.constant 0 : index
    %33 = vector.load %arg9[%c0_19, %c0_20, %c0_21] : memref<1x1x128xf32, #tpu.memory_space<vmem>>, vector<1x1x128xf32>
    %34 = vector.shape_cast %33 : vector<1x1x128xf32> to vector<1x128xf32>
    %c0_22 = arith.constant 0 : index
    %c0_23 = arith.constant 0 : index
    %c0_24 = arith.constant 0 : index
    %35 = vector.load %arg10[%c0_22, %c0_23, %c0_24] : memref<1x1x128xf32, #tpu.memory_space<vmem>>, vector<1x1x128xf32>
    %36 = vector.shape_cast %35 : vector<1x1x128xf32> to vector<1x128xf32>
    %cst_25 = arith.constant dense<0.000000e+00> : vector<8xf32>
    %37 = vector.multi_reduction <add>, %32, %cst_25 [1] : vector<8x128xf32> to vector<8xf32>
    %38 = vector.shape_cast %37 : vector<8xf32> to vector<8x1xf32>
    %39 = arith.mulf %32, %32 : vector<8x128xf32>
    %cst_26 = arith.constant dense<0.000000e+00> : vector<8xf32>
    %40 = vector.multi_reduction <add>, %39, %cst_26 [1] : vector<8x128xf32> to vector<8xf32>
    %41 = vector.shape_cast %40 : vector<8xf32> to vector<8x1xf32>
    %cst_27 = arith.constant 7.812500e-03 : f32
    %42 = vector.broadcast %cst_27 : f32 to vector<8x1xf32>
    %43 = arith.mulf %38, %42 : vector<8x1xf32>
    %cst_28 = arith.constant 7.812500e-03 : f32
    %44 = vector.broadcast %cst_28 : f32 to vector<8x1xf32>
    %45 = arith.mulf %41, %44 : vector<8x1xf32>
    %46 = arith.mulf %43, %43 : vector<8x1xf32>
    %47 = arith.subf %45, %46 : vector<8x1xf32>
    %48 = vector.broadcast %43 : vector<8x1xf32> to vector<8x128xf32>
    %49 = arith.subf %32, %48 : vector<8x128xf32>
    %cst_29 = arith.constant 9.99999974E-6 : f32
    %50 = vector.broadcast %cst_29 : f32 to vector<8x1xf32>
    %51 = arith.addf %47, %50 : vector<8x1xf32>
    %52 = math.rsqrt %51 : vector<8x1xf32>
    %53 = vector.broadcast %52 : vector<8x1xf32> to vector<8x128xf32>
    %54 = arith.mulf %49, %53 : vector<8x128xf32>
    %55 = vector.broadcast %34 : vector<1x128xf32> to vector<8x128xf32>
    %56 = arith.mulf %54, %55 : vector<8x128xf32>
    %57 = vector.broadcast %36 : vector<1x128xf32> to vector<8x128xf32>
    %58 = arith.addf %56, %57 : vector<8x128xf32>
    %59 = arith.addf %3, %58 : vector<8x128xf32>
    %c0_30 = arith.constant 0 : index
    %c0_31 = arith.constant 0 : index
    %60 = vector.load %arg14[%c0_30, %c0_31] : memref<8x128xf32, #tpu.memory_space<vmem>>, vector<8x128xf32>
    tpu.vector_store %arg14[%c0_30, %c0_31], %59 {strides = array<i32>} : memref<8x128xf32, #tpu.memory_space<vmem>>, vector<8x128xf32>,
    %c1_i32 = arith.constant 1 : i32
    %61 = arith.cmpi eq, %arg1, %c1_i32 : i32
    %62 = arith.extui %61 : i1 to i32
    %c0_i32_32 = arith.constant 0 : i32
    %63 = arith.cmpi ne, %62, %c0_i32_32 : i32
    scf.if %63 {
      %64 = arith.truncf %59 : vector<8x128xf32> to vector<8x128xbf16>
      %c0_33 = arith.constant 0 : index
      %c0_34 = arith.constant 0 : index
      %65 = vector.load %arg11[%c0_33, %c0_34] : memref<128x128xbf16, #tpu.memory_space<vmem>>, vector<128x128xbf16>
      %cst_35 = arith.constant dense<0.000000e+00> : vector<8x128xf32>
      %66 = tpu.matmul %64, %65, %cst_35 {dimension_numbers = #tpu.dot_dimension_numbers<[1], [0], [0], [1], [0, 0, 1, 1], [], []>} : vector<8x128xbf16>, vector<128x128xbf16>, vector<8x128xf32> -> vector<8x128xf32>
      %c0_36 = arith.constant 0 : index
      %c0_37 = arith.constant 0 : index
      %67 = vector.load %arg12[%c0_36, %c0_37] : memref<1x128xf32, #tpu.memory_space<vmem>>, vector<1x128xf32>
      %68 = vector.broadcast %67 : vector<1x128xf32> to vector<8x128xf32>
      %69 = arith.addf %66, %68 : vector<8x128xf32>
      %cst_38 = arith.constant dense<0xFF800000> : vector<8xf32>
      %70 = vector.multi_reduction <maximumf>, %69, %cst_38 [1] : vector<8x128xf32> to vector<8xf32>
      %71 = vector.shape_cast %70 : vector<8xf32> to vector<8x1xf32>
      %72 = vector.broadcast %71 : vector<8x1xf32> to vector<8x128xf32>
      %73 = arith.subf %69, %72 : vector<8x128xf32>
      %74 = math.exp %73 : vector<8x128xf32>
      %cst_39 = arith.constant dense<0.000000e+00> : vector<8xf32>
      %75 = vector.multi_reduction <add>, %74, %cst_39 [1] : vector<8x128xf32> to vector<8xf32>
      %76 = vector.shape_cast %75 : vector<8xf32> to vector<8x1xf32>
      %77 = tpu.reciprocal %76 {approx = true} : vector<8x1xf32> -> vector<8x1xf32>
      %78 = vector.broadcast %77 : vector<8x1xf32> to vector<8x128xf32>
      %79 = arith.mulf %74, %78 : vector<8x128xf32>
      %c0_40 = arith.constant 0 : index
      %c0_41 = arith.constant 0 : index
      %80 = vector.load %arg13[%c0_40, %c0_41] : memref<8x128xf32, #tpu.memory_space<vmem>>, vector<8x128xf32>
      tpu.vector_store %arg13[%c0_40, %c0_41], %79 {strides = array<i32>} : memref<8x128xf32, #tpu.memory_space<vmem>>, vector<8x128xf32>,
    } else {
    }
    return
  }
  func.func @transform_0(%arg0: i32, %arg1: i32) -> (i32, i32) {
    %c0_i32 = arith.constant 0 : i32
    %c0_i32_0 = arith.constant 0 : i32
    return %arg0, %c0_i32 : i32, i32
  }
  func.func @transform_1(%arg0: i32, %arg1: i32) -> (i32, i32) {
    %c0_i32 = arith.constant 0 : i32
    %c0_i32_0 = arith.constant 0 : i32
    %c0_i32_1 = arith.constant 0 : i32
    return %c0_i32, %c0_i32_0 : i32, i32
  }
  func.func @transform_2(%arg0: i32, %arg1: i32) -> (i32, i32) {
    %c0_i32 = arith.constant 0 : i32
    %c0_i32_0 = arith.constant 0 : i32
    %c0_i32_1 = arith.constant 0 : i32
    return %c0_i32, %c0_i32_0 : i32, i32
  }
  func.func @transform_3(%arg0: i32, %arg1: i32) -> (i32, i32, i32) {
    %c0_i32 = arith.constant 0 : i32
    %c0_i32_0 = arith.constant 0 : i32
    %c0_i32_1 = arith.constant 0 : i32
    return %arg1, %c0_i32, %c0_i32_0 : i32, i32, i32
  }
  func.func @transform_4(%arg0: i32, %arg1: i32) -> (i32, i32, i32) {
    %c0_i32 = arith.constant 0 : i32
    %c0_i32_0 = arith.constant 0 : i32
    %c0_i32_1 = arith.constant 0 : i32
    return %arg1, %c0_i32, %c0_i32_0 : i32, i32, i32
  }
  func.func @transform_5(%arg0: i32, %arg1: i32) -> (i32, i32, i32) {
    %c0_i32 = arith.constant 0 : i32
    %c0_i32_0 = arith.constant 0 : i32
    %c0_i32_1 = arith.constant 0 : i32
    return %arg1, %c0_i32, %c0_i32_0 : i32, i32, i32
  }
  func.func @transform_6(%arg0: i32, %arg1: i32) -> (i32, i32, i32) {
    %c0_i32 = arith.constant 0 : i32
    %c0_i32_0 = arith.constant 0 : i32
    %c0_i32_1 = arith.constant 0 : i32
    return %arg1, %c0_i32, %c0_i32_0 : i32, i32, i32
  }
  func.func @transform_7(%arg0: i32, %arg1: i32) -> (i32, i32, i32) {
    %c0_i32 = arith.constant 0 : i32
    %c0_i32_0 = arith.constant 0 : i32
    %c0_i32_1 = arith.constant 0 : i32
    return %arg1, %c0_i32, %c0_i32_0 : i32, i32, i32
  }
  func.func @transform_8(%arg0: i32, %arg1: i32) -> (i32, i32, i32) {
    %c0_i32 = arith.constant 0 : i32
    %c0_i32_0 = arith.constant 0 : i32
    %c0_i32_1 = arith.constant 0 : i32
    return %arg1, %c0_i32, %c0_i32_0 : i32, i32, i32
  }
  func.func @transform_9(%arg0: i32, %arg1: i32) -> (i32, i32) {
    %c0_i32 = arith.constant 0 : i32
    %c0_i32_0 = arith.constant 0 : i32
    %c0_i32_1 = arith.constant 0 : i32
    return %c0_i32, %c0_i32_0 : i32, i32
  }
  func.func @transform_10(%arg0: i32, %arg1: i32) -> (i32, i32) {
    %c0_i32 = arith.constant 0 : i32
    %c0_i32_0 = arith.constant 0 : i32
    %c0_i32_1 = arith.constant 0 : i32
    return %c0_i32, %c0_i32_0 : i32, i32
  }
  func.func @transform_11(%arg0: i32, %arg1: i32) -> (i32, i32) {
    %c0_i32 = arith.constant 0 : i32
    %c0_i32_0 = arith.constant 0 : i32
    return %arg0, %c0_i32 : i32, i32
  }
}

</mosaic_0001>

<bundles_post_ra>
// kernel: tpu_custom_call.1
= control target key start
LH: loop header
LB: loop body
LE: loop exit
PB: predicated region body
PF: predicated region fallthrough
CT: control target
= control target key end

     0   :  { %s2037_s0 = inlined_call_operand.hbm [shape: f32[8,16], index: 0, kind: input, shape index: {}]   ;;  %s2038_s1 = inlined_call_operand.hbm [shape: bf16[16,128], index: 1, kind: input, shape index: {}]   ;;  %s2039_s2 = inlined_call_operand.vmem [shape: f32[1,128], index: 2, kind: input, shape index: {}]   ;;  %s2040_s3 = inlined_call_operand.hbm [shape: bf16[2,128,128], index: 3, kind: input, shape index: {}]   ;;  %s2041_s4 = inlined_call_operand.vmem [shape: f32[2,1,128], index: 4, kind: input, shape index: {}]   ;;  %s2042_s5 = inlined_call_operand.hbm [shape: bf16[2,128,128], index: 5, kind: input, shape index: {}]   ;;  %s2043_s6 = inlined_call_operand.vmem [shape: f32[2,1,128], index: 6, kind: input, shape index: {}]   ;;  %s2044_s7 = inlined_call_operand.vmem [shape: f32[2,1,128], index: 7, kind: input, shape index: {}]   ;;  %s2045_s8 = inlined_call_operand.vmem [shape: f32[2,1,128], index: 8, kind: input, shape index: {}]   ;;  %s2046_s9 = inlined_call_operand.hbm [shape: bf16[128,128], index: 9, kind: input, shape index: {}]   ;;  %s2047_s10 = inlined_call_operand.vmem [shape: f32[1,128], index: 10, kind: input, shape index: {}]   ;;  %s2048_s11 = inlined_call_operand.hbm [shape: f32[8,128], index: 11, kind: output, shape index: {}]  }
   0x1   :  { %2059 = sst [smem:[#allocation20_spill]] %s2037_s0 }
   0x2   :  { %2060 = sst [smem:[#allocation21_spill]] %s2038_s1 }
   0x3   :  { %2061 = sst [smem:[#allocation22_spill]] %s2039_s2 }
   0x4   :  { %2062 = sst [smem:[#allocation23_spill]] %s2040_s3 }
   0x5   :  { %2063 = sst [smem:[#allocation24_spill]] %s2045_s8 }
   0x6   :  { %2064 = sst [smem:[#allocation25_spill]] %s2047_s10 }
   0x7   :  { %2065 = sst [smem:[#allocation26_spill]] %s2048_s11 }
   0x8   :  { %16 = vsyncpa [#allocation4], 0 }
   0x9   :  { %17 = vsyncpa [#allocation7], 0 }
   0xa   :  { %18 = vsyncpa [#allocation5], 0  ;;  %s1766_s17 = smov 0   ;;  %s1768_s18 = smov 0  }
   0xb   :  { %s1770_s19 = smov 0   ;;  %s1772_s20 = smov 0  }
   0xc   :  { %s1774_s21 = smov 0   ;;  %s1776_s22 = smov 0  }
   0xd LB: > { %2066 = sst [smem:[#allocation17_spill]] %s1686_s21  ;;  %s1795_s23 = sadd.s32 4294967295, %s1690_s22   ;;  %s1690_s22 = sphi %s1776_s22, %s24_s22   ;;  %s1686_s21 = sphi %s1774_s21, %s2095_s21   ;;  %s1682_s20 = sphi %s1772_s20, %s2094_s20   ;;  %s1678_s19 = sphi %s1770_s19, %s2098_s19   ;;  %s1674_s18 = sphi %s1768_s18, %s2097_s18   ;;  %s1670_s17 = sphi %s1766_s17, %s2096_s17  }
   0xe   : > { %2067 = sst [smem:[#allocation18_spill]] %s1690_s22  ;;  %p118_p0 = scmp.ne.s32.totalorder %s1678_s19, %s1674_s18 }
   0xf   : > { %p119_p1 = scmp.eq.s32.totalorder %s1690_s22, 0  ;;  %p124_p2 = scmp.ne.s32.totalorder %s1674_s18, %s1670_s17 }
  0x10   : > { %p2049_p3 = scmp.eq.s32.totalorder %s1795_s23, 0  ;;  %p1173_p5 = scmp.ge.s32.totalorder %s1690_s22, 1 }
  0x11   : > { %p120_p4 = por %p119_p1, %p118_p0  ;;  %p333_p7 = scmp.lt.s32.totalorder %s1690_s22, 3 }
  0x12   : > { %p1806_p6 = por %p2049_p3, %p124_p2  ;;  %s1692_s27 = smov [#allocation3]  }
  0x13   : > { %p1811_p8 = pnand %p1173_p5, %p333_p7  ;;  %s348_s28 = sshll.u32 %s1692_s27, 4  ;;  %s349_s28 = int_to_ptr.vmem [resolvable:$true] %s348_s28 }
  0x14   : > { %s2068_s25 = scalar_select %p1806_p6, 1, 0 }
  0x15   : > { %s2069_s26 = scalar_select %p1811_p8, 1, 0 }
  0x16   : > { %p1345_p9 = pneg %p1811_p8  ;;  %p1365_p10 = scmp.lt.s32.totalorder %s1690_s22, 2 }
  0x17   : > { %s1693_s12 = smov [#allocation6]   ;;  %s1477_s14 = scalar_lea.vmem %s349_s28, 128 }
  0x18   : > { %p1820_p11 = pnand %p1345_p9, %p2049_p3  ;;  %p1824_p12 = pnand %p1365_p10, %p120_p4 }
  0x19   : > { %s358_s13 = sshll.u32 %s1693_s12, 4  ;;  %p1478_p0 = scmp.ne.s32.totalorder %s349_s28, %s1477_s14  ;;  %s359_s13 = int_to_ptr.vmem [resolvable:$true] %s358_s13 }
  0x1a   : > { %p1468_p13 = pneg %p1820_p11  ;;  %p1485_p5 = scmp.lt.s32.totalorder %s349_s28, %s349_s28 }
  0x1b   : > { %p1486_p7 = scmp.lt.s32.totalorder %s1477_s14, %s1477_s14 }
  0x1c   : > { %p1480_p1 = pnand %p1478_p0, %p1468_p13 }
  0x1d   : > { %p1487_p9 = por %p1486_p7, %p1485_p5 }
  0x1e   : > { %p1481_p2 = pneg %p1480_p1 }
  0x20   : > { %p1488_p3 = pnand %p1487_p9, %p1481_p2 }
  0x22   : > { %1491 = shalt.err (!%p1488_p3)
}
  0x23   : > { %s2072_s0 = sld [smem:[#allocation20_spill]]  ;;  %s1503_s17 = scalar_lea.vmem %s359_s13, 128 }
  0x24   : > { %p1504_p4 = scmp.ne.s32.totalorder %s359_s13, %s1503_s17  ;;  %p1511_p1 = scmp.lt.s32.totalorder %s359_s13, %s359_s13 }
  0x25   : > { %p1512_p6 = scmp.lt.s32.totalorder %s1503_s17, %s1503_s17 }
  0x26   : > { %p1506_p10 = pnand %p1504_p4, %p1468_p13 }
  0x27   : > { %p1513_p8 = por %p1512_p6, %p1511_p1 }
  0x28   : > { %p1507_p0 = pneg %p1506_p10 }
  0x29   : > { %1348 = dma.hbm_to_vmem [thread:$0]  (!%p1820_p11), %s2072_s0, 128, %s349_s28, [#allocation4]  }
  0x2a   : > { %p1514_p5 = pnand %p1513_p8, %p1507_p0 }
  0x2c   : > { %1517 = shalt.err (!%p1514_p5)
}
  0x2d   : > { %s2052_s27 = smov 64   ;;  %s2054_s28 = smov 4  }
  0x2e   : > { %s2073_s1 = sld [smem:[#allocation21_spill]]  ;;  %s391_s15 = sand.u32 1, %s1690_s22  }
  0x2f   : > { %s33_s16 = sadd.s32 1, %s1686_s21  ;;  %s393_s17 = sand.u32 1, %s1678_s19  }
  0x30   : > { %p34_p3 = scmp.ge.s32.totalorder %s33_s16, 2  ;;  %s1852_s24 = sshll.u32 %s393_s17, 6 }
  0x31   : > { %s1228_s0 = sshll.u32 %s1686_s21, 10  ;;  %s2075_s3 = sld [smem:[#allocation23_spill]] }
  0x32   : > { %s2100_s16 = smov (%p34_p3, %s33_s16), 0  ;;  %s395_s12 = scalar_lea.vmem [#allocation8], %s1852_s24 }
  0x33   : > { %2074 = sst [smem:[#allocation19_spill]] %s2100_s16  ;;  %s108_s8 = ssub.s32 %s1686_s21, %s2100_s16 }
  0x34   : > { %1351 = dma.hbm_to_vmem [thread:$0]  (!%p1820_p11), %s2073_s1, 128, %s359_s13, [#allocation7], %s2052_s27, %s2052_s27, %s2054_s28  }
  0x35   : > { %s402_s14 = sshll.u32 %s395_s12, 4  ;;  %p1863_p6 = scmp.eq.s32.totalorder %s108_s8, 0  ;;  %s403_s14 = int_to_ptr.vmem [resolvable:$true] %s402_s14 }
  0x36   : > { %s1867_s27 = scalar_lea.sflag [#allocation4], %s391_s15  ;;  %p1520_p8 = pneg %p1824_p12 }
  0x37   : > { %s401_s2 = scalar_lea.hbm %s2075_s3, %s1228_s0  ;;  %s1531_s17 = scalar_lea.vmem %s403_s14, 1024 }
  0x38   : > { %p1532_p2 = scmp.ne.s32.totalorder %s403_s14, %s1531_s17  ;;  %s1696_s10 = smov [#allocation8]  }
  0x39   : > { %s1536_s11 = sshll.u32 %s1696_s10, 4  ;;  %s1537_s11 = int_to_ptr.vmem [resolvable:$false] %s1536_s11 }
  0x3a   : > { %p1534_p7 = pnand %p1532_p2, %p1520_p8  ;;  %s1538_s28 = scalar_lea.vmem %s1537_s11, 2048 }
  0x3b   : > { %p1539_p4 = scmp.lt.s32.totalorder %s403_s14, %s1537_s11  ;;  %p1540_p10 = scmp.lt.s32.totalorder %s1538_s28, %s1531_s17 }
  0x3c   : > { %p1535_p9 = pneg %p1534_p7 }
  0x3d   : > { %p1541_p0 = por %p1540_p10, %p1539_p4 }
  0x3f   : > { %p1542_p1 = pnand %p1541_p0, %p1535_p9 }
  0x41   : > { %1545 = shalt.err (!%p1542_p1)
}
  0x42   : > { %s2077_s8 = smov 4   ;;  %s2078_s15 = smov 64  }
  0x43   : > { %1358 = dma.hbm_to_vmem [thread:$0]  (!%p1824_p12), %s401_s2, 1024, %s403_s14, %s1867_s27, %s2078_s15, %s2078_s15, %s2077_s8  }
  0x44   : > { %s2079_s12 = sadd.s32 1, %s1678_s19  ;;  %s1697_s28 = smov [#allocation10]  }
  0x45   : > { %s1885_s10 = scalar_select %p1863_p6, %s1678_s19, %s2079_s12  }
  0x46   : > { %s374_s17 = sshll.u32 %s1697_s28, 4  ;;  %s1890_s3 = scalar_lea.hbm %s2042_s5, %s1228_s0  ;;  %s375_s17 = int_to_ptr.vmem [resolvable:$true] %s374_s17 }
  0x47   : > { %s422_s16 = scalar_lea.vmem [#allocation9], %s1852_s24  ;;  %s1557_s22 = scalar_lea.vmem %s375_s17, 1024 }
  0x48   : > { %s429_s21 = sshll.u32 %s422_s16, 4  ;;  %p1558_p5 = scmp.ne.s32.totalorder %s375_s17, %s1557_s22  ;;  %s430_s21 = int_to_ptr.vmem [resolvable:$true] %s429_s21 }
  0x49   : > { %p1565_p7 = scmp.lt.s32.totalorder %s375_s17, %s375_s17  ;;  %p1566_p9 = scmp.lt.s32.totalorder %s1557_s22, %s1557_s22 }
  0x4a   : > { %p1560_p3 = pnand %p1558_p5, %p1468_p13 }
  0x4b   : > { %p1567_p6 = por %p1566_p9, %p1565_p7 }
  0x4c   : > { %p1561_p2 = pneg %p1560_p3 }
  0x4e   : > { %p1568_p4 = pnand %p1567_p6, %p1561_p2 }
  0x50   : > { %1571 = shalt.err (!%p1568_p4)
}
  0x51   : > { %1354 = dma.hbm_to_vmem [thread:$0]  (!%p1820_p11), %s2046_s9, 1024, %s375_s17, [#allocation7], %s2078_s15, %s2078_s15, %s2077_s8  }
  0x52   : > { %s1585_s2 = scalar_lea.vmem %s430_s21, 1024  ;;  %s1698_s22 = smov [#allocation9]  }
  0x53   : > { %p1586_p10 = scmp.ne.s32.totalorder %s430_s21, %s1585_s2  ;;  %s1590_s24 = sshll.u32 %s1698_s22, 4  ;;  %s1591_s24 = int_to_ptr.vmem [resolvable:$false] %s1590_s24 }
  0x54   : > { %s1592_s16 = scalar_lea.vmem %s1591_s24, 2048  ;;  %p1593_p1 = scmp.lt.s32.totalorder %s430_s21, %s1591_s24 }
  0x55   : > { %p1588_p13 = pnand %p1586_p10, %p1520_p8  ;;  %p1594_p5 = scmp.lt.s32.totalorder %s1592_s16, %s1585_s2 }
  0x57   : > { %p1589_p0 = pneg %p1588_p13  ;;  %p1595_p3 = por %p1594_p5, %p1593_p1 }
  0x59   : > { %p1596_p2 = pnand %p1595_p3, %p1589_p0 }
  0x5b   : > { %1599 = shalt.err (!%p1596_p2)
}
  0x5c   : > { %1361 = dma.hbm_to_vmem [thread:$0]  (!%p1824_p12), %s1890_s3, 1024, %s430_s21, %s1867_s27, %s2078_s15, %s2078_s15, %s2077_s8  }
  0x5d   : > { %p2080_p11 = scmp.ne.s32.totalorder %s2069_s26, 0 }
  0x5e   : > { %p2081_p8 = scmp.eq.s32.totalorder (!%p2080_p11), %s1795_s23, 0 }
  0x5f   : > { %459 = sbr.rel (%p2080_p11) target bundleno = 1534 (0x5fe), region = 64 }
  0x64   : > { %1649 = dma.done.wait (%p2081_p8), [#allocation4], 128   ;;  %p2082_p7 = pmov %p2081_p8 }
  0x66   : > { %1651 = vsyncadd (%p2082_p7), [#allocation4], 4294967168  ;;  %p2083_p9 = pmov %p2082_p7 }
  0x67   : > { %p2084_p6 = pmov %p2082_p7 }
  0x68   : > { %1653 = dma.done.wait (%p2083_p9), [#allocation7], 128  }
  0x69   : > { %1655 = vsyncadd (%p2084_p6), [#allocation7], 4294967168  ;;  %s469_s29 = sand.u32 1, %s1795_s23   ;;  %s471_s3 = sand.u32 1, %s1674_s18  }
  0x6a   : > { %s1187_s21 = sshll.u32 %s471_s3, 6  ;;  %s470_s26 = scalar_lea.sflag [#allocation4], %s469_s29 }
  0x6b   : > { %s1926_s30 = scalar_lea.vmem [#allocation8], %s1187_s21  ;;  %p2085_p12 = scmp.ne.s32.totalorder %s2068_s25, 0 }
  0x6d   : > { %1657 = dma.done.wait (%p2085_p12), %s470_s26, 2048  }
  0x6e   : > { %1659 = vsyncadd (%p2085_p12), %s470_s26, 4294965248  ;;  %s1932_s27 = scalar_lea.vmem [#allocation9], %s1187_s21  ;;  %p2086_p4 = pmov %p2084_p6 }
  0x70   : > { %1661 = dma.done.wait (%p2086_p4), [#allocation7], 1024   ;;  %p2087_p10 = pmov %p2086_p4 }
  0x71   : > { %p537_p13 = scmp.lt.s32.totalorder %s1682_s20, 1  ;;  %s2088_s22 = sld [smem:[#allocation24_spill]] }
  0x72   : > { %1663 = vsyncadd (%p2087_p10), [#allocation7], 4294966272  ;;  %p1190_p0 = scmp.ne.s32.totalorder %s1682_s20, 0 }
  0x73   : > { %s1940_s14 = scalar_select %p537_p13, %s1682_s20, 1 }
  0x74   : > { %553 = sbr.rel (%p1190_p0) target bundleno = 350 (0x15e), region = 88  ;;  %s2089_s3 = sld [smem:[#allocation22_spill]] (!%p1190_p0) }
  0x75   : > { %s539_s25 = scalar_lea.vmem %s2041_s4, %s1940_s14  ;;  %s542_s28 = scalar_lea.vmem %s2043_s6, %s1940_s14 }
  0x76   : > { %s545_s0 = scalar_lea.vmem %s2044_s7, %s1940_s14 }
  0x77   : > { %s548_s24 = scalar_lea.vmem %s2088_s22, %s1940_s14 }
  0x79   : > { %v1431_v0 = vld [vmem:[#allocation6] sm:$0xff]   ;;  %v1699_v1 = vmov 0.0   ;;  %v554_v2 = vld [vmem:[#allocation3] sm:$0xff]  ;;  %vm1700_vm0 = vmmov 0   ;;  %vm571_vm1 = vcmask 130048  }
  0x7a   : > { %1259 = vmatprep.subr.bf16.mxu0 %v1699_v1  ;;  %1261 = vmatprep.mubr.msk.bf16.mxu0 %vm1700_vm0, %v1699_v1  ;;  %v555_v3 = vpack.c.bf16 %v554_v2, %v554_v2  ;;  %v1191_v4 = vld [vmem:[%s2089_s3] ss:$0 sm:$0xff] }
  0x7b   : > { %1260 = vmatpush3.bf16.msra.mxu0 %v1431_v0 }
  0x7e   : > { %1262 = vmatmul.mubr.msk.bf16.vlgmr.msra.gmra.mxu0 %vm571_vm1, %v555_v3 }
 0x13e   : > { %v609_v5 = vpop.f32.mrf.mxu0 }
 0x13f   : > { %v610_v6 = vadd.f32 %v1191_v4, %v609_v5 }
 0x140   : > { %v1263_v7 = vpop.f32.mrf.mxu0 }
 0x141   : > { %v616_v8 = vmul.f32 0.044715, %v610_v6  ;;  %v615_v16 = vmul.f32 0.5, %v610_v6 }
 0x142   : > { %v612_v9 = vpop.f32.mrf.mxu0 }
 0x143   : > { %v617_v10 = vmul.f32 %v616_v8, %v610_v6 }
 0x144   : > { %v1264_v11 = vpop.f32.mrf.mxu0 }
 0x145   : > { %v618_v12 = vmul.f32 %v617_v10, %v610_v6 }
 0x147   : > { %v619_v13 = vadd.f32 %v618_v12, %v610_v6 }
 0x149   : > { %v620_v14 = vmul.f32 0.7978846, %v619_v13 }
 0x14b   : > { %1432 = vtanh.f32 %v620_v14 }
 0x158   : > { %v1433_v15 = vpop.eup %1432 }
 0x159   : > { %v622_v17 = vadd.f32 1.0, %v1433_v15 }
 0x15b   : > { %v623_v18 = vmul.f32 %v622_v17, %v615_v16 }
 0x15d   : > { %624 = vst [vmem:[#allocation2] sm:$0xff] %v623_v18 }
 0x15e PF: > { %v1434_v19 = vld [vmem:[%s1926_s30 + $0x38] sm:$0xff]   ;;  %v1701_v20 = vmov 0.0   ;;  %v1435_v21 = vld [vmem:[%s1926_s30 + $0x30] sm:$0xff]   ;;  %vm1702_vm2 = vmmov 0   ;;  %v1436_v22 = vld [vmem:[%s1926_s30 + $0x28] sm:$0xff]   ;;  %p1214_p1 = scmp.ne.s32.totalorder %s1682_s20, 1 }
 0x15f   : > { %1265 = vmatprep.subr.bf16.mxu0 %v1701_v20  ;;  %1285 = vmatprep.subr.bf16.mxu1 %v1701_v20  ;;  %v1437_v23 = vld [vmem:[%s1926_s30 + $0x20] sm:$0xff]   ;;  %v1438_v24 = vld [vmem:[%s1926_s30 + $0x18] sm:$0xff]   ;;  %v1439_v25 = vld [vmem:[%s1926_s30 + $0x10] sm:$0xff]  }
 0x160   : > { %1266 = vmatpush3.bf16.msra.mxu0 %v1434_v19  ;;  %1281 = vmatprep.mubr.msk.bf16.mxu0 %vm1702_vm2, %v1701_v20  ;;  %v1440_v26 = vld [vmem:[%s1926_s30 + $0x8] sm:$0xff]   ;;  %v1441_v27 = vld [vmem:[%s1926_s30] sm:$0xff]   ;;  %v1442_v30 = vld [vmem:[%s1932_s27 + $0x38] sm:$0xff]  }
 0x161   : > { %1267 = vmatprep.subr.bf16.mxu0 %v1701_v20  ;;  %1301 = vmatprep.mubr.msk.bf16.mxu1 %vm1702_vm2, %v1701_v20  ;;  %v1443_v31 = vld [vmem:[%s1932_s27 + $0x30] sm:$0xff]   ;;  %v1444_v32 = vld [vmem:[%s1932_s27 + $0x28] sm:$0xff]   ;;  %v1445_v33 = vld [vmem:[%s1932_s27 + $0x20] sm:$0xff]  }
 0x162   : > { %1286 = vmatpush3.bf16.msra.mxu1 %v1442_v30  ;;  %v1446_v34 = vld [vmem:[%s1932_s27 + $0x18] sm:$0xff]   ;;  %v1447_v35 = vld [vmem:[%s1932_s27 + $0x10] sm:$0xff]   ;;  %v1448_v36 = vld [vmem:[%s1932_s27 + $0x8] sm:$0xff]  }
 0x163   : > { %1287 = vmatprep.subr.bf16.mxu1 %v1701_v20  ;;  %v1449_v37 = vld [vmem:[%s1932_s27] sm:$0xff]   ;;  %v1194_v38 = vld [vmem:[%s539_s25] ss:$0 sm:$0xff] }
 0x164   : > { %1268 = vmatpush3.bf16.msra.mxu0 %v1435_v21  ;;  %v1970_v28 = vld [vmem:[#allocation2] sm:$0xff] }
 0x165   : > { %1269 = vmatprep.subr.bf16.mxu0 %v1701_v20  ;;  %v626_v29 = vpack.c.bf16 %v1970_v28, %v1970_v28  ;;  %v1203_v54 = vld [vmem:[%s542_s28] ss:$0 sm:$0xff]  ;;  %s2091_s28 = sld [smem:[#allocation25_spill]] (!%p1214_p1) }
 0x166   : > { %1288 = vmatpush3.bf16.msra.mxu1 %v1443_v31  ;;  %v1212_v6 = vld [vmem:[%s545_s0] ss:$0 sm:$0xff] }
 0x167   : > { %1289 = vmatprep.subr.bf16.mxu1 %v1701_v20  ;;  %v1213_v8 = vld [vmem:[%s548_s24] ss:$0 sm:$0xff] }
 0x168   : > { %1270 = vmatpush3.bf16.msra.mxu0 %v1436_v22 }
 0x169   : > { %1271 = vmatprep.subr.bf16.mxu0 %v1701_v20 }
 0x16a   : > { %1290 = vmatpush3.bf16.msra.mxu1 %v1444_v32 }
 0x16b   : > { %1291 = vmatprep.subr.bf16.mxu1 %v1701_v20 }
 0x16c   : > { %1272 = vmatpush3.bf16.msra.mxu0 %v1437_v23 }
 0x16d   : > { %1273 = vmatprep.subr.bf16.mxu0 %v1701_v20 }
 0x16e   : > { %1292 = vmatpush3.bf16.msra.mxu1 %v1445_v33 }
 0x16f   : > { %1293 = vmatprep.subr.bf16.mxu1 %v1701_v20 }
 0x170   : > { %1274 = vmatpush3.bf16.msra.mxu0 %v1438_v24 }
 0x171   : > { %1275 = vmatprep.subr.bf16.mxu0 %v1701_v20 }
 0x172   : > { %1294 = vmatpush3.bf16.msra.mxu1 %v1446_v34 }
 0x173   : > { %1295 = vmatprep.subr.bf16.mxu1 %v1701_v20 }
 0x174   : > { %1276 = vmatpush3.bf16.msra.mxu0 %v1439_v25 }
 0x175   : > { %1277 = vmatprep.subr.bf16.mxu0 %v1701_v20 }
 0x176   : > { %1296 = vmatpush3.bf16.msra.mxu1 %v1447_v35 }
 0x177   : > { %1297 = vmatprep.subr.bf16.mxu1 %v1701_v20 }
 0x178   : > { %1278 = vmatpush3.bf16.msra.mxu0 %v1440_v26 }
 0x179   : > { %1279 = vmatprep.subr.bf16.mxu0 %v1701_v20 }
 0x17a   : > { %1298 = vmatpush3.bf16.msra.mxu1 %v1448_v36 }
 0x17b   : > { %1299 = vmatprep.subr.bf16.mxu1 %v1701_v20 }
 0x17c   : > { %1280 = vmatpush3.bf16.msra.mxu0 %v1441_v27 }
 0x17e   : > { %1300 = vmatpush3.bf16.msra.mxu1 %v1449_v37 }
 0x17f   : > { %1282 = vmatmul.mubr.bf16.vlgmr.msra.gmra.mxu0 %v626_v29 }
 0x23f   : > { %v732_v39 = vpop.f32.mrf.mxu0 }
 0x240   : > { %v733_v40 = vadd.f32 %v1194_v38, %v732_v39 }
 0x241   : > { %v1283_v41 = vpop.f32.mrf.mxu0 }
 0x242   : > { %v739_v42 = vmul.f32 0.044715, %v733_v40  ;;  %v738_v50 = vmul.f32 0.5, %v733_v40 }
 0x243   : > { %v735_v43 = vpop.f32.mrf.mxu0 }
 0x244   : > { %v740_v44 = vmul.f32 %v739_v42, %v733_v40 }
 0x245   : > { %v1284_v45 = vpop.f32.mrf.mxu0 }
 0x246   : > { %v741_v46 = vmul.f32 %v740_v44, %v733_v40 }
 0x248   : > { %v742_v47 = vadd.f32 %v741_v46, %v733_v40 }
 0x24a   : > { %v743_v48 = vmul.f32 0.7978846, %v742_v47 }
 0x24c   : > { %1450 = vtanh.f32 %v743_v48 }
 0x259   : > { %v1451_v49 = vpop.eup %1450 }
 0x25a   : > { %v745_v51 = vadd.f32 1.0, %v1451_v49 }
 0x25c   : > { %v746_v52 = vmul.f32 %v745_v51, %v738_v50 }
 0x25e   : > { %v747_v53 = vpack.c.bf16 %v746_v52, %v746_v52 }
 0x260   : > { %1302 = vmatmul.mubr.bf16.vlgmr.msra.gmra.mxu1 %v747_v53 }
 0x320   : > { %v853_v55 = vpop.f32.mrf.mxu1 }
 0x321   : > { %v854_v56 = vadd.f32 %v1203_v54, %v853_v55 }
 0x322   : > { %v1303_v57 = vpop.f32.mrf.mxu1 }
 0x323   : > { %861 = vadd.xlane.f32.xlu0 %v854_v56  ;;  %v863_v59 = vmul.f32 %v854_v56, %v854_v56 }
 0x324   : > { %v856_v58 = vpop.f32.mrf.mxu1 }
 0x326   : > { %v1304_v60 = vpop.f32.mrf.mxu1 }
 0x327   : > { %864 = vadd.xlane.f32.xlu0 %v863_v59 }
 0x3ac   : > { %v862_v61 = vpop.xlane.xlu0 %861 }
 0x3ad   : > { %v866_v62 = vmul.f32 0.0078125, %v862_v61 }
 0x3af   : > { %v868_v0 = vmul.f32 %v866_v62, %v866_v62  ;;  %v870_v4 = vsub.f32 %v854_v56, %v866_v62 }
 0x3b0   : > { %v865_v63 = vpop.xlane.xlu0 %864 }
 0x3b1   : > { %v867_v1 = vmul.f32 0.0078125, %v865_v63 }
 0x3b3   : > { %v869_v2 = vsub.f32 %v867_v1, %v868_v0 }
 0x3b5   : > { %v871_v3 = vadd.f32 1e-05, %v869_v2 }
 0x3b7   : > { %1452 = vrsqrt.f32 %v871_v3 }
 0x3c4   : > { %v1453_v5 = vpop.eup %1452 }
 0x3c5   : > { %v873_v7 = vmul.f32 %v1453_v5, %v870_v4 }
 0x3c7   : > { %v880_v9 = vmul.f32 %v1212_v6, %v873_v7 }
 0x3c9   : > { %v887_v10 = vadd.f32 %v1213_v8, %v880_v9  ;;  %893 = sbr.rel (%p1214_p1) target bundleno = 1513 (0x5e9), region = 92 }
 0x3cb   : > { %v888_v11 = vadd.f32 %v887_v10, %v1970_v28 }
 0x3cd   : > { %889 = vst [vmem:[#allocation2] sm:$0xff] %v888_v11 }
 0x3ce   : > { %v1454_v12 = vld [vmem:[#allocation10 + $0x38] sm:$0xff]   ;;  %v1703_v13 = vmov 0.0   ;;  %v1455_v14 = vld [vmem:[#allocation10 + $0x30] sm:$0xff]   ;;  %vm1704_vm3 = vmmov 0   ;;  %v1456_v15 = vld [vmem:[#allocation10 + $0x28] sm:$0xff]   ;;  %v894_v21 = vpack.c.bf16 %v888_v11, %v888_v11 }
 0x3cf   : > { %1305 = vmatprep.subr.bf16.mxu0 %v1703_v13  ;;  %1321 = vmatprep.mubr.msk.bf16.mxu0 %vm1704_vm3, %v1703_v13  ;;  %v1457_v16 = vld [vmem:[#allocation10 + $0x20] sm:$0xff]   ;;  %v1458_v17 = vld [vmem:[#allocation10 + $0x18] sm:$0xff]   ;;  %v1459_v18 = vld [vmem:[#allocation10 + $0x10] sm:$0xff]  }
 0x3d0   : > { %1306 = vmatpush3.bf16.msra.mxu0 %v1454_v12  ;;  %v1460_v19 = vld [vmem:[#allocation10 + $0x8] sm:$0xff]   ;;  %v1461_v20 = vld [vmem:[#allocation10] sm:$0xff]  }
 0x3d1   : > { %1307 = vmatprep.subr.bf16.mxu0 %v1703_v13  ;;  %v1215_v22 = vld [vmem:[%s2091_s28] ss:$0 sm:$0xff] }
 0x3d4   : > { %1308 = vmatpush3.bf16.msra.mxu0 %v1455_v14 }
 0x3d5   : > { %1309 = vmatprep.subr.bf16.mxu0 %v1703_v13 }
 0x3d8   : > { %1310 = vmatpush3.bf16.msra.mxu0 %v1456_v15 }
 0x3d9   : > { %1311 = vmatprep.subr.bf16.mxu0 %v1703_v13 }
 0x3dc   : > { %1312 = vmatpush3.bf16.msra.mxu0 %v1457_v16 }
 0x3dd   : > { %1313 = vmatprep.subr.bf16.mxu0 %v1703_v13 }
 0x3e0   : > { %1314 = vmatpush3.bf16.msra.mxu0 %v1458_v17 }
 0x3e1   : > { %1315 = vmatprep.subr.bf16.mxu0 %v1703_v13 }
 0x3e4   : > { %1316 = vmatpush3.bf16.msra.mxu0 %v1459_v18 }
 0x3e5   : > { %1317 = vmatprep.subr.bf16.mxu0 %v1703_v13 }
 0x3e8   : > { %1318 = vmatpush3.bf16.msra.mxu0 %v1460_v19 }
 0x3e9   : > { %1319 = vmatprep.subr.bf16.mxu0 %v1703_v13 }
 0x3ec   : > { %1320 = vmatpush3.bf16.msra.mxu0 %v1461_v20 }
 0x3ef   : > { %1322 = vmatmul.mubr.bf16.vlgmr.msra.gmra.mxu0 %v894_v21 }
 0x4af   : > { %v1000_v23 = vpop.f32.mrf.mxu0 }
 0x4b0   : > { %v1001_v24 = vadd.f32 %v1215_v22, %v1000_v23 }
 0x4b1   : > { %v1323_v25 = vpop.f32.mrf.mxu0 }
 0x4b2   : > { %1006 = vmax.xlane.f32.xlu0 %v1001_v24 }
 0x4b3   : > { %v1003_v26 = vpop.f32.mrf.mxu0 }
 0x4b5   : > { %v1324_v27 = vpop.f32.mrf.mxu0 }
 0x53b   : > { %v1007_v28 = vpop.xlane.xlu0 %1006 }
 0x53c   : > { %v1008_v29 = vsub.f32 %v1001_v24, %v1007_v28 }
 0x53e   : > { %v1009_v30 = vmul.f32 1.442695, %v1008_v29 }
 0x540   : > { %1462 = vpow2.f32 %v1009_v30 }
 0x54d   : > { %v1463_v31 = vpop.eup %1462 }
 0x54e   : > { %1011 = vadd.xlane.f32.xlu0 %v1463_v31 }
 0x5d7   : > { %v1012_v32 = vpop.xlane.xlu0 %1011 }
 0x5d8   : > { %1464 = vrcp.f32 %v1012_v32 }
 0x5e5   : > { %v1465_v33 = vpop.eup %1464 }
 0x5e6   : > { %v1014_v34 = vmul.f32 %v1465_v33, %v1463_v31 }
 0x5e8   : > { %1015 = vst [vmem:[#allocation11] sm:$0xff] %v1014_v34 }
 0x5e9 PF: > { %p1369_p5 = scmp.eq.s32.totalorder %s1795_s23, 1  ;;  %s1705_s17 = smov [#allocation11]  }
 0x5ea   : > { %s1025_s11 = sshll.u32 %s1705_s17, 4  ;;  %s1026_s11 = int_to_ptr.vmem [resolvable:$true] %s1025_s11 }
 0x5eb   : > { %s1600_s0 = scalar_lea.vmem %s1026_s11, 128  ;;  %p1607_p8 = scmp.lt.s32.totalorder %s1026_s11, %s1026_s11 }
 0x5ec   : > { %p1601_p3 = scmp.ne.s32.totalorder %s1026_s11, %s1600_s0  ;;  %p1608_p7 = scmp.lt.s32.totalorder %s1600_s0, %s1600_s0 }
 0x5ee   : > { %p1602_p2 = pnand %p1601_p3, %p1369_p5  ;;  %p1609_p9 = por %p1608_p7, %p1607_p8 }
 0x5f0   : > { %p1603_p11 = pneg %p1602_p2 }
 0x5f2   : > { %p1610_p6 = pnand %p1609_p9, %p1603_p11 }
 0x5f4   : > { %1613 = shalt.err (!%p1610_p6)
}
 0x5f5   : > { %s2092_s22 = sld [smem:[#allocation26_spill]] }
 0x5fb   : > { %1342 = dma.vmem_to_hbm [thread:$0]  (%p1369_p5), %s1026_s11, 128, %s2092_s22, [#allocation5]  }
 0x5fc   : > { %1665 = dma.done.wait (%p1369_p5), [#allocation5], 128  }
 0x5fd   : > { %1667 = vsyncadd (%p1369_p5), [#allocation5], 4294967168 }
 0x5fe PF: > { %s2093_s24 = sld [smem:[#allocation18_spill]]  ;;  %s2096_s17 = smov %s1674_s18 }
 0x5ff   : > { %s2094_s20 = sld [smem:[#allocation17_spill]]  ;;  %s2097_s18 = smov %s1678_s19 }
 0x600   : > { %s2095_s21 = sld [smem:[#allocation19_spill]]  ;;  %s2098_s19 = smov %s1885_s10 }
 0x604   : > { %s24_s22 = sadd.s32 1, %s2093_s24  }
 0x605   : > { %p21_p12 = scmp.ge.s32.totalorder %s24_s22, 4  }
 0x607   :  { %23 = sbr.rel (!%p21_p12) target bundleno = 13 (0xd), region = 145 }
 0x60c   :  { %1038 = vsyncpa [#allocation4], 1 }
 0x60d   :  { %1040 = vsyncpa [#allocation4 + $0x1], 1 }
 0x60e   :  { %1041 = vsyncpa [#allocation7], 1 }
 0x60f   :  { %1042 = vsyncpa [#allocation5], 1 }
 0x610   :  { %1044 = vsyncpa [#allocation5 + $0x1], 1 }

</bundles_post_ra>
